<compile_context>
chip_gen: v5e
topology: v5e:2x2
jax: 0.10.0
libtpu: 0.0.40
codegen_flags: <defaults>
</compile_context>

<pallas_src>
import functools
import math

import numpy as np
import jax
import jax.numpy as jnp
from jax.experimental import pallas as pl
from jax.experimental.pallas import tpu as pltpu


_MXU_DTYPE = jnp.bfloat16   # matmul-operand dtype for the image resample


# ----------------------------------------------------------------------------
# Interpolation weight matrices (host-side, memoized).
# Reproduce torch.nn.functional.interpolate(..., align_corners=False).
# ----------------------------------------------------------------------------
def _cubic_weights(t, a=-0.75):
    # t: fractional offset in [0, 1). PyTorch bicubic (Keys cubic, a=-0.75).
    def c1(x):  # |x| <= 1
        return ((a + 2.0) * x - (a + 3.0)) * x * x + 1.0

    def c2(x):  # 1 < |x| < 2
        return ((a * x - 5.0 * a) * x + 8.0 * a) * x - 4.0 * a

    return c2(t + 1.0), c1(t), c1(1.0 - t), c2(2.0 - t)


@functools.lru_cache(maxsize=None)
def _bicubic_np(out_size, in_size):
    scale = in_size / out_size
    out_idx = np.arange(out_size)
    src = (out_idx + 0.5) * scale - 0.5
    i0 = np.floor(src).astype(np.int64)
    t = src - i0
    w = np.stack(_cubic_weights(t), axis=1)  # (out, 4)
    W = np.zeros((out_size, in_size), dtype=np.float64)
    for k in range(4):
        idx = np.clip(i0 - 1 + k, 0, in_size - 1)
        np.add.at(W, (out_idx, idx), w[:, k])
    return W


@functools.lru_cache(maxsize=None)
def _bilinear_np(out_size, in_size):
    scale = in_size / out_size
    out_idx = np.arange(out_size)
    src = np.maximum((out_idx + 0.5) * scale - 0.5, 0.0)
    i0 = np.minimum(np.floor(src).astype(np.int64), in_size - 1)
    i1 = np.minimum(i0 + 1, in_size - 1)
    lam = src - i0
    W = np.zeros((out_size, in_size), dtype=np.float64)
    np.add.at(W, (out_idx, i0), 1.0 - lam)
    np.add.at(W, (out_idx, i1), lam)
    return W


# ----------------------------------------------------------------------------
# Tile pickers (VMEM-budget aware; keep >= 2 parallel grid steps for megacore).
# ----------------------------------------------------------------------------
def _pick_cp_lane_tile(w, h, budget_bytes=4 * 1024 * 1024):
    """Lane tile for the control-point upsample output block (1, h, TW)."""
    if w <= 128:
        return w
    t = min(w, max(128, budget_bytes // (h * 4)))
    t -= t % 128
    return max(t, 128)


def _pick_sublane_tile(R, C, B, budget_bytes=8 * 1024 * 1024):
    """Sublane tile S for apply_noise blocks (1, C, S, 128).
    Per grid step all operand blocks move (3C+3)*S*128*4 bytes."""
    per_row = (3 * C + 3) * 128 * 4
    S = min(R, max(8, budget_bytes // per_row))
    if S < R:
        S -= S % 8
        S = max(S, 8)
    # keep >= 2 total grid steps for v7x megacore when the spatial dim allows
    if B * pl.cdiv(R, S) < 2 and R >= 16:
        S = max(8, (R // 2) - ((R // 2) % 8))
    return S


def _pick_lane_tile(n, C, B, budget_bytes=8 * 1024 * 1024):
    """Lane tile T for the 3-D fallback apply_noise layout (1, C, T)."""
    if n < 256:
        return n
    per_lane = (3 * C + 3) * 4
    t = min(n, max(128, budget_bytes // per_lane))
    t -= t % 128
    t = max(t, 128)
    if B * pl.cdiv(n, t) < 2 and n >= 256:
        t = max(128, (n // 2) - ((n // 2) % 128))
    return t


# ----------------------------------------------------------------------------
# Pallas kernel 1: separable control-point bicubic upsample.
#   out[m] = Wh (h, gh) @ CP[m] (gh, gw) @ Ww^T (gw, TW)
# One grid step per (field, lane-tile); weights stay resident, only the
# (M, h, w) output touches HBM in volume.
# ----------------------------------------------------------------------------
def _cp_upsample_kernel(cp_ref, wh_ref, wwt_ref, o_ref):
    cp = cp_ref[0]                                                    # (gh, gw)
    tmp = jnp.dot(cp, wwt_ref[...], preferred_element_type=jnp.float32)  # (gh, TW)
    out = jnp.dot(wh_ref[...], tmp, preferred_element_type=jnp.float32)  # (h, TW)
    o_ref[0] = out.astype(o_ref.dtype)


def cp_upsample(cp_stack, wh, wwt):
    """cp_stack: (M, gh, gw) -> (M, h, w) via separable bicubic weights."""
    M, gh, gw = cp_stack.shape
    h = wh.shape[0]
    w = wwt.shape[1]
    TW = _pick_cp_lane_tile(w, h)
    grid = (M, pl.cdiv(w, TW))
    return pl.pallas_call(
        _cp_upsample_kernel,
        out_shape=jax.ShapeDtypeStruct((M, h, w), jnp.float32),
        grid=grid,
        in_specs=[
            pl.BlockSpec((1, gh, gw), lambda m, n: (m, 0, 0)),
            pl.BlockSpec((h, gh), lambda m, n: (0, 0)),
            pl.BlockSpec((gw, TW), lambda m, n: (0, n)),
        ],
        out_specs=pl.BlockSpec((1, h, TW), lambda m, n: (m, 0, n)),
        compiler_params=pltpu.CompilerParams(
            dimension_semantics=("parallel", "parallel"),
            vmem_limit_bytes=32 * 1024 * 1024),
    )(cp_stack, jnp.asarray(wh, jnp.float32), jnp.asarray(wwt, jnp.float32))


# ----------------------------------------------------------------------------
# Pallas kernel 2: batched separable image resample (only used when
# downsample_factor != 1):  out[b] = Wh @ x[b] @ WwT  for a block of images.
# Weights are pre-cast to bf16 on host and stay resident; the width stage is
# one flattened (tb*Hin, Win)@(Win, Wout) matmul; f32 accumulation (amp-style).
# ----------------------------------------------------------------------------
def _image_resample_kernel(wh_ref, wwt_ref, x_ref, o_ref):
    tb, Hin, Win = x_ref.shape
    Wout = o_ref.shape[2]
    wh = wh_ref[...]                                  # (Hout, Hin) bf16, resident
    wwt = wwt_ref[...]                                # (Win, Wout) bf16, resident
    if Hin % 8 == 0:
        # width stage: one big-M matmul for the whole batch block
        x = x_ref[...].astype(_MXU_DTYPE).reshape(tb * Hin, Win)
        tmp = jnp.dot(x, wwt, preferred_element_type=jnp.float32)     # (tb*Hin, Wout)
        tmp = tmp.reshape(tb, Hin, Wout).astype(_MXU_DTYPE)
    else:
        tmp = None
    for b in range(tb):                               # static, unrolled
        if tmp is not None:
            t_b = tmp[b]
        else:
            t_b = jnp.dot(x_ref[b].astype(_MXU_DTYPE), wwt,
                          preferred_element_type=jnp.float32).astype(_MXU_DTYPE)
        out = jnp.dot(wh, t_b, preferred_element_type=jnp.float32)    # (Hout, Wout)
        o_ref[b] = out.astype(o_ref.dtype)


def resample(x, wh, wwt):
    """x: (B, C, Hin, Win) -> (B, C, Hout, Wout) via separable bilinear weights."""
    B, C, Hin, Win = x.shape
    Hout, Wout = wh.shape[0], wwt.shape[1]
    BC = B * C
    # VMEM-aware batch tile: double-buffered f32 in+out blocks must fit budget
    per_img = (Hin * Win + Hout * Wout) * 4 * 2       # double-buffered in+out
    budget = 16 * 1024 * 1024
    tb = max(1, min(BC, 8, budget // max(per_img, 1)))
    if BC > 1 and pl.cdiv(BC, tb) < 2:                # keep >= 2 steps (megacore)
        tb = max(1, (BC + 1) // 2)
    xf = x.reshape(BC, Hin, Win)
    wh_b = jnp.asarray(np.asarray(wh, np.float32), _MXU_DTYPE)
    wwt_b = jnp.asarray(np.asarray(wwt, np.float32), _MXU_DTYPE)
    out = pl.pallas_call(
        _image_resample_kernel,
        out_shape=jax.ShapeDtypeStruct((BC, Hout, Wout), x.dtype),
        grid=(pl.cdiv(BC, tb),),
        in_specs=[
            pl.BlockSpec((Hout, Hin), lambda i: (0, 0)),
            pl.BlockSpec((Win, Wout), lambda i: (0, 0)),
            pl.BlockSpec((tb, Hin, Win), lambda i: (i, 0, 0)),
        ],
        out_specs=pl.BlockSpec((tb, Hout, Wout), lambda i: (i, 0, 0)),
        compiler_params=pltpu.CompilerParams(
            dimension_semantics=("parallel",),
            vmem_limit_bytes=48 * 1024 * 1024),
    )(wh_b, wwt_b, xf)
    return out.reshape(B, C, Hout, Wout)


# ----------------------------------------------------------------------------
# Pallas kernel 3: fused elementwise noise application.
#   D = I_d * lambda_delta * Delta
#   I = max(I, D)
#   I = I * (lambda_speckle * N + (1 - lambda_speckle))
#   I = (I + 1e-6) ** Gamma           (base > 0 assumed -> exp(g*log) EUP path)
# Preferred layout: (B, C, HW//128, 128) so sublanes come from HW (full vreg
# fill even at C=1); Delta/N/Gamma broadcast over C in-kernel.
# Math kept in f32 (v5e VPU/EUP have no bf16; pow near tiny bases needs f32).
# ----------------------------------------------------------------------------
def _noise_apply_kernel(i_ref, id_ref, delta_ref, n_ref, gamma_ref, o_ref, *,
                        lambda_delta, lambda_speckle):
    i = i_ref[...].astype(jnp.float32)          # (1, C, S, 128) or (1, C, T)
    i_d = id_ref[...].astype(jnp.float32)
    delta = delta_ref[...].astype(jnp.float32)  # (1, 1, S, 128) or (1, 1, T)
    n = n_ref[...].astype(jnp.float32)
    g = gamma_ref[...].astype(jnp.float32)

    d = i_d * (lambda_delta * delta)
    x = jnp.maximum(i, d)
    x = x * (lambda_speckle * n + (1.0 - lambda_speckle))
    # base is strictly positive, so pow == exp(g * log(base)) (EUP path)
    x = jnp.exp(g * jnp.log(x + 1e-6))
    o_ref[...] = x.astype(o_ref.dtype)


def apply_noise(I_new, I_d, Delta, N, Gamma, lambda_delta, lambda_speckle):
    """I_new, I_d: (B, C, H, W); Delta, N, Gamma: (B, H, W) (or (B, H*W))."""
    B, C, H, W = I_new.shape
    HW = H * W
    kern = functools.partial(_noise_apply_kernel,
                             lambda_delta=float(lambda_delta),
                             lambda_speckle=float(lambda_speckle))
    cparams = pltpu.CompilerParams(
        dimension_semantics=("parallel", "parallel"),
        vmem_limit_bytes=48 * 1024 * 1024)

    if HW % 128 == 0:
        # Repacked layout: sublanes from HW -> full vreg occupancy.
        R = HW // 128
        If = I_new.reshape(B, C, R, 128)
        Idf = I_d.reshape(B, C, R, 128)
        Df = Delta.reshape(B, 1, R, 128)
        Nf = N.reshape(B, 1, R, 128)
        Gf = Gamma.reshape(B, 1, R, 128)
        S = _pick_sublane_tile(R, C, B)
        grid = (B, pl.cdiv(R, S))
        img_spec = pl.BlockSpec((1, C, S, 128), lambda b, s: (b, 0, s, 0))
        fld_spec = pl.BlockSpec((1, 1, S, 128), lambda b, s: (b, 0, s, 0))
        out = pl.pallas_call(
            kern,
            out_shape=jax.ShapeDtypeStruct((B, C, R, 128), I_new.dtype),
            grid=grid,
            in_specs=[img_spec, img_spec, fld_spec, fld_spec, fld_spec],
            out_specs=img_spec,
            compiler_params=cparams,
        )(If, Idf, Df, Nf, Gf)
        return out.reshape(B, C, H, W)

    # Fallback lane-dense layout for HW not divisible by 128.
    If = I_new.reshape(B, C, HW)
    Idf = I_d.reshape(B, C, HW)
    Df = Delta.reshape(B, 1, HW)
    Nf = N.reshape(B, 1, HW)
    Gf = Gamma.reshape(B, 1, HW)
    T = _pick_lane_tile(HW, C, B)
    grid = (B, pl.cdiv(HW, T))
    img_spec = pl.BlockSpec((1, C, T), lambda b, n: (b, 0, n))
    fld_spec = pl.BlockSpec((1, 1, T), lambda b, n: (b, 0, n))
    out = pl.pallas_call(
        kern,
        out_shape=jax.ShapeDtypeStruct((B, C, HW), I_new.dtype),
        grid=grid,
        in_specs=[img_spec, img_spec, fld_spec, fld_spec, fld_spec],
        out_specs=img_spec,
        compiler_params=cparams,
    )(If, Idf, Df, Nf, Gf)
    return out.reshape(B, C, H, W)


# ----------------------------------------------------------------------------
# NoiseModel forward (parameters sampled deterministically from a PRNGKey).
# ----------------------------------------------------------------------------
def init_noise_model_params(key, num_b, grid_size=(9, 9), dtype=jnp.float32):
    ks = jax.random.split(key, 5)
    c_shape = (num_b, 1) + tuple(grid_size)

    def sample_unbound(k):
        # 10 ** (Beta(2,2) * 2 - 1), like ControlPointBetaNoise.reset_params
        b = jax.random.beta(k, 2.0, 2.0, c_shape, dtype=dtype)
        return jnp.power(10.0, b * 2.0 - 1.0)

    return {
        "vessel_alpha_unbound": sample_unbound(ks[0]),
        "vessel_beta_unbound": sample_unbound(ks[1]),
        "speckle_alpha_unbound": sample_unbound(ks[2]),
        "speckle_beta_unbound": sample_unbound(ks[3]),
        "control_points_gamma": jax.random.uniform(ks[4], c_shape, dtype=dtype),
    }


def noise_model_forward(I, I_d, params, key,
                        lambda_delta=1.0, lambda_speckle=0.7, lambda_gamma=0.3,
                        downsample_factor=1):
    B, C, H, W = I.shape
    h = int(math.floor(H * (1.0 / downsample_factor)))
    w = int(math.floor(W * (1.0 / downsample_factor)))

    # --- bilinear resize of I to (h, w); skipped entirely when identity ------
    if (h, w) != (H, W):
        I_new = resample(I, _bilinear_np(h, H), _bilinear_np(w, W).T)
    else:
        I_new = I

    # I_d must already match the working (h, w) resolution (as in PyTorch,
    # where the broadcast against Delta would otherwise fail).
    assert I_d.shape == (B, C, h, w), (
        f"I_d must have shape {(B, C, h, w)}, got {I_d.shape}")

    # --- separable control-point bicubic upsample (5 fields, one kernel) -----
    gh, gw = params["control_points_gamma"].shape[-2:]
    gp = (jnp.clip(params["control_points_gamma"], 0.0, 1.0)
          * (2.0 * lambda_gamma) + (1.0 - lambda_gamma))
    cp_stack = jnp.concatenate([
        params["vessel_alpha_unbound"].reshape(B, gh, gw),
        params["vessel_beta_unbound"].reshape(B, gh, gw),
        params["speckle_alpha_unbound"].reshape(B, gh, gw),
        params["speckle_beta_unbound"].reshape(B, gh, gw),
        gp.reshape(B, gh, gw),
    ], axis=0).astype(jnp.float32)                                   # (5B, gh, gw)
    fields = cp_upsample(cp_stack, _bicubic_np(h, gh), _bicubic_np(w, gw).T)
    A_v, B_v, A_s, B_s, Gamma = jnp.split(fields, 5, axis=0)         # each (B, h, w)

    # --- Beta(A, B) reparameterized sampling ---------------------------------
    # TODO(synk): Beta rsample needs gamma rejection sampling; no clean Pallas
    # primitive, so the sampling itself stays in jax.random.beta.
    k_delta, k_speckle = jax.random.split(key)
    Delta = jax.random.beta(k_delta, jnp.maximum(A_v, 0.001),
                            jnp.maximum(B_v, 0.001)).astype(I.dtype)
    N = jax.random.beta(k_speckle, jnp.maximum(A_s, 0.001),
                        jnp.maximum(B_s, 0.001)).astype(I.dtype)

    # --- fused elementwise noise application ----------------------------------
    out = apply_noise(I_new, I_d, Delta, N, Gamma, lambda_delta, lambda_speckle)

    # --- final bilinear resize back; skipped when identity --------------------
    if (h, w) != (H, W):
        # TODO(synk): could fuse apply_noise into this up-resample's prologue to
        # drop one HBM read+write of the working image on the downsampled path.
        out = resample(out, _bilinear_np(H, h), _bilinear_np(W, w).T)
    return out


if __name__ == "__main__":
    key = jax.random.PRNGKey(0)
    k_param, k_i, k_id, k_noise, k_id2, k_noise2 = jax.random.split(key, 6)

    B, C, H, W = 2, 4, 16, 16
    I = jax.random.uniform(k_i, (B, C, H, W), dtype=jnp.float32)
    I_d = jax.random.uniform(k_id, (B, C, H, W), dtype=jnp.float32)

    params = init_noise_model_params(k_param, B, grid_size=(9, 9))

    # Common case: downsample_factor == 1 (identity resizes skipped).
    out = noise_model_forward(I, I_d, params, k_noise,
                              lambda_delta=1.0, lambda_speckle=0.7,
                              lambda_gamma=0.3, downsample_factor=1)
    out = jax.block_until_ready(out)
    assert out.shape == (B, C, H, W)
    assert bool(jnp.all(jnp.isfinite(out)))

    # Also exercise the batched bilinear resample path (factor != 1); as in the
    # PyTorch module, I_d must be supplied at the downsampled resolution.
    h2, w2 = H // 2, W // 2
    I_d_small = jax.random.uniform(k_id2, (B, C, h2, w2), dtype=jnp.float32)
    out2 = noise_model_forward(I, I_d_small, params, k_noise2,
                               lambda_delta=1.0, lambda_speckle=0.7,
                               lambda_gamma=0.3, downsample_factor=2)
    out2 = jax.block_until_ready(out2)
    assert out2.shape == (B, C, H, W)
    assert bool(jnp.all(jnp.isfinite(out2)))

    print("KERNEL_OK")
</pallas_src>

<mosaic_0001>
module attributes {stable_mosaic.version = 11 : i64} {
  func.func @_cp_upsample_kernel(%arg0: i32, %arg1: i32, %arg2: memref<1x9x9xf32, #tpu.memory_space<vmem>>, %arg3: memref<16x9xf32, #tpu.memory_space<vmem>>, %arg4: memref<9x16xf32, #tpu.memory_space<vmem>>, %arg5: memref<1x16x16xf32, #tpu.memory_space<vmem>>) attributes {dimension_semantics = [#tpu.dimension_semantics<parallel>, #tpu.dimension_semantics<parallel>], iteration_bounds = array<i64: 10, 1>, scalar_prefetch = 0 : i64, scratch_operands = 0 : i64, tpu.core_type = #tpu.core_type<tc>, window_params = [{transform_indices = @transform_0, window_bounds = array<i64: 1, 9, 9>}, {pipeline_mode = #tpu.pipeline_mode<synchronous>, transform_indices = @transform_1, window_bounds = array<i64: 16, 9>}, {transform_indices = @transform_2, window_bounds = array<i64: 9, 16>}, {transform_indices = @transform_3, window_bounds = array<i64: 1, 16, 16>}]} {
    %c0 = arith.constant 0 : index
    %c0_0 = arith.constant 0 : index
    %c0_1 = arith.constant 0 : index
    %0 = vector.load %arg2[%c0, %c0_0, %c0_1] : memref<1x9x9xf32, #tpu.memory_space<vmem>>, vector<1x9x9xf32>
    %1 = vector.shape_cast %0 : vector<1x9x9xf32> to vector<9x9xf32>
    %c0_2 = arith.constant 0 : index
    %c0_3 = arith.constant 0 : index
    %2 = vector.load %arg4[%c0_2, %c0_3] : memref<9x16xf32, #tpu.memory_space<vmem>>, vector<9x16xf32>
    %cst = arith.constant dense<0.000000e+00> : vector<9x16xf32>
    %3 = tpu.matmul %1, %2, %cst {dimension_numbers = #tpu.dot_dimension_numbers<[1], [0], [0], [1], [0, 0, 1, 1], [], []>} : vector<9x9xf32>, vector<9x16xf32>, vector<9x16xf32> -> vector<9x16xf32>
    %c0_4 = arith.constant 0 : index
    %c0_5 = arith.constant 0 : index
    %4 = vector.load %arg3[%c0_4, %c0_5] : memref<16x9xf32, #tpu.memory_space<vmem>>, vector<16x9xf32>
    %cst_6 = arith.constant dense<0.000000e+00> : vector<16x16xf32>
    %5 = tpu.matmul %4, %3, %cst_6 {dimension_numbers = #tpu.dot_dimension_numbers<[1], [0], [0], [1], [0, 0, 1, 1], [], []>} : vector<16x9xf32>, vector<9x16xf32>, vector<16x16xf32> -> vector<16x16xf32>
    %c0_7 = arith.constant 0 : index
    %c0_8 = arith.constant 0 : index
    %c0_9 = arith.constant 0 : index
    %6 = vector.load %arg5[%c0_7, %c0_8, %c0_9] : memref<1x16x16xf32, #tpu.memory_space<vmem>>, vector<1x16x16xf32>
    %7 = vector.shape_cast %6 : vector<1x16x16xf32> to vector<16x16xf32>
    %8 = vector.shape_cast %5 : vector<16x16xf32> to vector<1x16x16xf32>
    tpu.vector_store %arg5[%c0_7, %c0_8, %c0_9], %8 {strides = array<i32>} : memref<1x16x16xf32, #tpu.memory_space<vmem>>, vector<1x16x16xf32>,
    return
  }
  func.func @transform_0(%arg0: i32, %arg1: i32) -> (i32, i32, i32) {
    %c0_i32 = arith.constant 0 : i32
    %c0_i32_0 = arith.constant 0 : i32
    %c0_i32_1 = arith.constant 0 : i32
    return %arg0, %c0_i32, %c0_i32_0 : i32, i32, i32
  }
  func.func @transform_1(%arg0: i32, %arg1: i32) -> (i32, i32) {
    %c0_i32 = arith.constant 0 : i32
    %c0_i32_0 = arith.constant 0 : i32
    %c0_i32_1 = arith.constant 0 : i32
    return %c0_i32, %c0_i32_0 : i32, i32
  }
  func.func @transform_2(%arg0: i32, %arg1: i32) -> (i32, i32) {
    %c0_i32 = arith.constant 0 : i32
    %c0_i32_0 = arith.constant 0 : i32
    return %c0_i32, %arg1 : i32, i32
  }
  func.func @transform_3(%arg0: i32, %arg1: i32) -> (i32, i32, i32) {
    %c0_i32 = arith.constant 0 : i32
    %c0_i32_0 = arith.constant 0 : i32
    return %arg0, %c0_i32, %arg1 : i32, i32, i32
  }
}

</mosaic_0001>

<bundles_post_ra>
// kernel: tpu_custom_call.1
= control target key start
LH: loop header
LB: loop body
LE: loop exit
PB: predicated region body
PF: predicated region fallthrough
CT: control target
= control target key end

     0   :  { %8 = vsyncpa [#allocation3], 0  ;;  %s677_s0 = inlined_call_operand.vmem [shape: f32[10,9,9], index: 0, kind: input, shape index: {}]   ;;  %s678_s1 = inlined_call_operand.vmem [shape: f32[16,9], index: 1, kind: input, shape index: {}]   ;;  %s679_s2 = inlined_call_operand.vmem [shape: f32[9,16], index: 2, kind: input, shape index: {}]   ;;  %s680_s3 = inlined_call_operand.hbm [shape: f32[10,16,16], index: 3, kind: output, shape index: {}]  }
   0x1   :  { %10 = vsyncpa [#allocation3 + $0x1], 0  ;;  %s564_s12 = smov 0   ;;  %s566_s13 = smov 0  }
   0x2   :  { %s568_s14 = smov 0   ;;  %s570_s15 = smov 0  }
   0x3   :  { %s572_s16 = smov 0   ;;  %s574_s17 = smov 0  }
   0x4 LB: > { %s379_s18 = sadd.s32 4294967295, %s540_s17   ;;  %s380_s19 = sadd.s32 4294967294, %s540_s17   ;;  %s540_s17 = sphi %s574_s17, %s16_s17   ;;  %s536_s16 = sphi %s572_s16, %s687_s16   ;;  %s532_s15 = sphi %s570_s15, %s686_s15   ;;  %s528_s14 = sphi %s568_s14, %s685_s14   ;;  %s524_s13 = sphi %s566_s13, %s684_s13   ;;  %s520_s12 = sphi %s564_s12, %s683_s12  }
   0x5   : > { %s28_s20 = sadd.s32 1, %s536_s16  ;;  %s110_s21 = sadd.s32 1, %s528_s14 }
   0x6   : > { %p30_p0 = scmp.ge.s32.totalorder %s28_s20, 10  ;;  %p120_p1 = scmp.ne.s32.totalorder %s528_s14, %s524_s13 }
   0x7   : > { %p121_p2 = scmp.eq.s32.totalorder %s379_s18, 9  ;;  %p126_p3 = scmp.ne.s32.totalorder %s524_s13, %s520_s12 }
   0x8   : > { %s689_s20 = smov (%p30_p0, %s28_s20), 0  ;;  %p127_p5 = scmp.eq.s32.totalorder %s380_s19, 9 }
   0x9   : > { %p604_p4 = por %p121_p2, %p120_p1  ;;  %s105_s23 = ssub.s32 %s536_s16, %s689_s20 }
   0xa   : > { %p384_p6 = scmp.ge.s32.totalorder %s540_s17, 1  ;;  %p108_p7 = scmp.eq.s32.totalorder %s105_s23, 0 }
   0xb   : > { %p611_p8 = por %p127_p5, %p126_p3  ;;  %p163_p9 = scmp.lt.s32.totalorder %s540_s17, 11 }
   0xc   : > { %s617_s25 = scalar_select %p108_p7, %s528_s14, %s110_s21  }
   0xd   : > { %p164_p10 = pnand %p384_p6, %p163_p9 }
   0xe   : > { %p191_p11 = scmp.lt.s32.totalorder (!%p164_p10), %s532_s15, 9  ;;  %s188_s18 = sand.u32 (!%p164_p10), 1, %s524_s13  }
   0xf   : > { %167 = sbr.rel (%p164_p10) target bundleno = 296 (0x128), region = 32  ;;  %s385_s19 = sshll.u32 (!%p164_p10), %s188_s18, 4 }
  0x10   : > { %s400_s21 = sshll.u32 (!%p164_p10), %s532_s15, 4  ;;  %s190_s28 = scalar_lea.vmem (!%p164_p10), [#allocation2], %s385_s19 }
  0x11   : > { %s288_s27 = scalar_lea.hbm (!%p164_p10), %s680_s3, %s400_s21  ;;  %s289_s29 = sshll.u32 (!%p164_p10), %s190_s28, 4  ;;  %s290_s29 = int_to_ptr.vmem [resolvable:$true] %s289_s29 }
  0x12   : > { %s482_s8 = scalar_lea.hbm (!%p164_p10), %s680_s3, 160 }
  0x14   : > { %v203_v0 = vld [vmem:[%s679_s2 + $0x8] sm:$0x1]  ;;  %vm211_vm0 = vcmask 1040384   ;;  %v202_v1 = vld [vmem:[%s679_s2] sm:$0xff]  ;;  %s192_s30 = scalar_select %p191_p11, %s532_s15, 9  ;;  %vm204_vm1 = vcmask 72704  }
  0x15   : > { %401 = vmatpush.msk.msra.mxu2 %vm211_vm0, %v203_v0  ;;  %388 = vmatpush.msk.msra.mxu0 %vm211_vm0, %v203_v0  ;;  %v239_v6 = vld [vmem:[%s678_s1 + $0x8] sm:$0xff]  ;;  %v238_v7 = vld [vmem:[%s678_s1] sm:$0xff]  ;;  %vm272_vm2 = vcmask 130048  }
  0x16   : > { %s399_s4 = sshll.u32 %s192_s30, 4  ;;  %s291_s30 = sshll.u32 %s288_s27, 4  ;;  %s292_s30 = int_to_ptr.hbm [resolvable:$true] %s291_s30 }
  0x17   : > { %402 = vmatpush.msra.mxu2 %v202_v1  ;;  %230 = vmatpush.msra.mxu0 %v202_v1  ;;  %s195_s7 = scalar_lea.vmem %s677_s0, %s399_s4  ;;  %s276_s4 = scalar_lea.sflag [#allocation3], %s188_s18 }
  0x18   : > { %v201_v2 = vld [vmem:[%s195_s7 + $0x8] sm:$0x1]  ;;  %v200_v3 = vld [vmem:[%s195_s7] sm:$0xff]  ;;  %s476_s5 = sshra.s32 %s292_s30, 4  ;;  %s477_s5 = int_to_ptr.hbm [resolvable:$true] %s476_s5 }
  0x19   : > { %390 = vmatmul.msk.f32.vlgmr.msra.gmra.mxu2 %vm204_vm1, %v201_v2  ;;  %389 = vmatmul.msk.f32.vlgmr.msra.gmra.mxu0 %vm204_vm1, %v200_v3  ;;  %s478_s6 = scalar_lea.hbm %s477_s5, 16  ;;  %p483_p1 = scmp.lt.s32.totalorder %s477_s5, %s680_s3 }
  0x1a   : > { %p479_p12 = scmp.ne.s32.totalorder %s477_s5, %s478_s6  ;;  %p484_p2 = scmp.lt.s32.totalorder %s482_s8, %s478_s6 }
  0x1c   : > { %p480_p13 = pnand %p479_p12, %p604_p4  ;;  %p485_p3 = por %p484_p2, %p483_p1 }
  0x1e   : > { %p481_p0 = pneg %p480_p13 }
  0x20   : > { %p486_p5 = pnand %p485_p3, %p481_p0 }
  0x96   : > { %v232_v5 = vpop.f32.mrf.mxu0 }
  0x9c   : > { %v235_v4 = vpop.f32.mrf.mxu2 }
  0x9d   : > { %391 = vmatpush.msk.msra.mxu1 %vm211_vm0, %v235_v4  ;;  %403 = vmatpush.msk.msra.mxu3 %vm211_vm0, %v235_v4 }
  0x9f   : > { %264 = vmatpush.msra.mxu1 %v232_v5  ;;  %404 = vmatpush.msra.mxu3 %v232_v5 }
  0xa0   : > { %393 = vmatmul.msk.f32.vlgmr.msra.gmra.mxu3 %vm204_vm1, %v239_v6  ;;  %392 = vmatmul.msk.f32.vlgmr.msra.gmra.mxu1 %vm204_vm1, %v238_v7 }
 0x11d   : > { %v266_v8 = vpop.f32.mrf.mxu1 }
 0x11e   : > { %273 = vst.msk [vmem:[%s190_s28] sm:$0xff] %vm272_vm2, %v266_v8 }
 0x123   : > { %v269_v9 = vpop.f32.mrf.mxu3 }
 0x124   : > { %274 = vst.msk [vmem:[%s190_s28 + $0x8] sm:$0xff] %vm272_vm2, %v269_v9 }
 0x125   : > { %489 = shalt.err (!%p486_p5)
}
 0x126   : > { %s542_s11 = smov 128   ;;  %s543_s18 = smov 8  }
 0x127   : > { %405 = dma.vmem_to_hbm [thread:$0]  (%p604_p4), %s290_s29, 256, %s292_s30, %s276_s4, %s542_s11, %s542_s11, %s543_s18  }
 0x128 PF: > { %p411_p6 = scmp.ge.s32.totalorder %s540_s17, 2  ;;  %s306_s19 = sand.u32 1, %s520_s12  }
 0x129   : > { %s307_s21 = scalar_lea.sflag [#allocation3], %s306_s19 }
 0x12a   : > { %p408_p7 = pnand %p411_p6, %p611_p8 }
 0x12c   : > { %p409_p9 = pneg %p408_p7 }
 0x12e   : > { %515 = dma.done.wait (%p409_p9), %s307_s21, 256  }
 0x12f   : > { %517 = vsyncadd (%p409_p9), %s307_s21, 4294967040  ;;  %s16_s17 = sadd.s32 1, %s540_s17   ;;  %s683_s12 = smov %s524_s13 }
 0x130   : > { %p13_p10 = scmp.ge.s32.totalorder %s16_s17, 12   ;;  %s684_s13 = smov %s528_s14 }
 0x131   : > { %s685_s14 = smov %s617_s25  ;;  %s686_s15 = smov %s536_s16 }
 0x132   : > { %s687_s16 = smov %s689_s20  ;;  %15 = sbr.rel (!%p13_p10) target bundleno = 4 (0x4), region = 70 }
 0x137   :  { %313 = vsyncpa [#allocation3], 1 }
 0x138   :  { %315 = vsyncpa [#allocation3 + $0x1], 1 }

</bundles_post_ra>
